<compile_context>
chip_gen: v6e
topology: v6e:2x2x1
jax: 0.10.0
libtpu: 0.0.40
codegen_flags: <defaults>
</compile_context>

<pallas_src>
import functools

import jax
import jax.numpy as jnp
from jax import lax
from jax.experimental import pallas as pl
from jax.experimental.pallas import tpu as pltpu


def _round_up(x, m):
    return (x + m - 1) // m * m


def _pad2(x, rows, cols):
    r, c = x.shape
    if r == rows and c == cols:
        return x
    return jnp.pad(x, ((0, rows - r), (0, cols - c)))


def _onehot_as(onehot_bool, dtype):
    oh = onehot_bool.astype(jnp.float32)
    return oh if dtype == jnp.float32 else oh.astype(dtype)


# --------------------------------------------------------------------------- #
# Pass 1: per-class counts + first/second feature moments (EstimatorCV stats).
#   grid = (n_par "parallel", tiles "arbitrary").  Per-slice partials accumulate
#   directly in the resident output blocks (init on tile 0); the tiny finalize
#   (divide / variance / masking) runs in the wrapper on (C, A).
# --------------------------------------------------------------------------- #
def _cv_stats_kernel(feat_ref, lab_ref, cnt_ref, sum_ref, sq_ref):
    i = pl.program_id(1)

    @pl.when(i == 0)
    def _init():
        cnt_ref[...] = jnp.zeros_like(cnt_ref)
        sum_ref[...] = jnp.zeros_like(sum_ref)
        sq_ref[...] = jnp.zeros_like(sq_ref)

    feats = feat_ref[...]                                  # (TN, A_pad) producer dtype
    labels = lab_ref[...]                                  # (TN, 1) int32, -1 on pad rows
    tn = feats.shape[0]
    c_pad = sum_ref.shape[0]

    onehot = lax.broadcasted_iota(jnp.int32, (tn, c_pad), 1) == labels    # bool
    oh_f32 = onehot.astype(jnp.float32)

    # Per-class sample counts: VPU/XLU sublane reduction (no dedicated MXU pass).
    cnt_ref[...] += jnp.sum(oh_f32, axis=0, keepdims=True)                # (1, C_pad)

    # First moment: producer-dtype MXU operands (bf16 when inputs are bf16),
    # f32 accumulation via preferred_element_type.
    sum_ref[...] += lax.dot_general(_onehot_as(onehot, feats.dtype), feats,
                                    (((0,), (0,)), ((), ())),
                                    preferred_element_type=jnp.float32)

    # Second moment stays in f32 (variance-cancellation guard; see TODO).
    f32 = feats.astype(jnp.float32)
    sq_ref[...] += lax.dot_general(oh_f32, f32 * f32,
                                   (((0,), (0,)), ((), ())),
                                   preferred_element_type=jnp.float32)


# --------------------------------------------------------------------------- #
# Pass 2: isda_aug + cross entropy, reduced in-kernel to per-slice partial sums.
# --------------------------------------------------------------------------- #
def _aug_ce_kernel(ratio_ref, lab_ref, cov_ref, w_ref, wsq_ref, logit_ref,
                   out_ref, *, num_classes):
    i = pl.program_id(1)

    @pl.when(i == 0)
    def _init():
        out_ref[...] = jnp.zeros_like(out_ref)

    ratio = ratio_ref[0, 0]                                # scalar from SMEM
    labels = lab_ref[...]                                  # (TN, 1) int32
    cov = cov_ref[...]                                     # (C_pad, A_pad) f32, resident
    w = w_ref[...]                                         # (C_pad, A_pad) producer dtype
    wsq = wsq_ref[...]                                     # (C_pad, A_pad) = W*W, resident
    logits = logit_ref[...].astype(jnp.float32)            # (TN, C_pad)

    tn = labels.shape[0]
    c_pad = cov.shape[0]
    class_iota = lax.broadcasted_iota(jnp.int32, (tn, c_pad), 1)
    onehot = class_iota == labels                          # bool (TN, C_pad)

    # Gather CV[l_n] (kept f32) and W[l_n] via one-hot matmuls — no concat buffers.
    # TODO(synk): for large C, an XLA take between passes halves this MXU work.
    cv_n = jnp.dot(onehot.astype(jnp.float32), cov,
                   preferred_element_type=jnp.float32)     # (TN, A_pad) f32
    w_l = jnp.dot(_onehot_as(onehot, w.dtype), w,
                  preferred_element_type=jnp.float32)      # (TN, A_pad) f32

    # sigma2 = t1 - 2*t2 + t3; big contractions run at the producer dtype with f32
    # accumulation; t3 stays on the f32 VPU.  W*W (wsq) is precomputed in the wrapper.
    t3 = jnp.sum(w_l * w_l * cv_n, axis=1, keepdims=True)                 # (TN, 1)
    t1 = lax.dot_general(cv_n.astype(wsq.dtype), wsq,
                         (((1,), (1,)), ((), ())),
                         preferred_element_type=jnp.float32)              # (TN, C_pad)
    t2 = lax.dot_general((-2.0 * w_l * cv_n).astype(w.dtype), w,
                         (((1,), (1,)), ((), ())),
                         preferred_element_type=jnp.float32)              # (TN, C_pad)
    aug = logits + (0.5 * ratio) * (t1 + t2 + t3)                         # noise=False

    # Cross entropy; padded class columns masked out of the log-sum-exp,
    # padded rows (label == -1) masked out of the partial sum.
    valid_c = class_iota < num_classes
    aug_m = jnp.where(valid_c, aug, jnp.float32(-1e30))
    m = jnp.max(aug_m, axis=1, keepdims=True)
    lse = m + jnp.log(jnp.sum(jnp.exp(aug_m - m), axis=1, keepdims=True))
    picked = jnp.sum(jnp.where(onehot, aug, 0.0), axis=1, keepdims=True)
    row_valid = (labels >= 0).astype(jnp.float32)
    tile_sum = jnp.sum((lse - picked) * row_valid, axis=0, keepdims=True)  # (1, 1)
    out_ref[...] += tile_sum


# --------------------------------------------------------------------------- #
# Wrapper
# --------------------------------------------------------------------------- #
def endo_loss(fc_weight, logits, features, target_x, ratio, *,
              n_tile=512, n_par=2):
    """EndoLoss.forward(fc, logits, features, target_x, ratio) — default branch
    (entity_mask=None, noise=False), EstimatorCV starting from its zero state.

    Inputs keep their producer dtype (pass bf16 for native-MXU contractions);
    statistics / softmax math runs in f32 in-kernel.
    """
    n, a = features.shape
    c = fc_weight.shape[0]

    a_pad = _round_up(a, 128)
    c_pad = _round_up(c, 128)
    tn = _round_up(min(n_tile, _round_up(n, 8)), 8)
    tiles_total = -(-n // tn)
    tiles_per_par = -(-tiles_total // n_par)
    n_pad = tiles_per_par * n_par * tn

    feats_p = _pad2(features, n_pad, a_pad)
    w_p = _pad2(fc_weight, c_pad, a_pad)
    logits_p = _pad2(logits, n_pad, c_pad)
    labels_p = jnp.pad(target_x.astype(jnp.int32), (0, n_pad - n),
                       constant_values=-1).reshape(n_pad, 1)
    ratio_arr = jnp.full((1, 1), ratio, dtype=jnp.float32)
    # Grid-invariant W*W hoisted out of the pass-2 body (squared in f32, stored at
    # the producer dtype for the MXU).
    w_f32 = w_p.astype(jnp.float32)
    wsq_p = (w_f32 * w_f32).astype(w_p.dtype)

    f_isz = feats_p.dtype.itemsize
    l_isz = logits_p.dtype.itemsize
    w_isz = w_p.dtype.itemsize
    est_p1 = (2 * (tn * a_pad * f_isz + tn * 4)
              + 2 * (c_pad * 4 + 2 * c_pad * a_pad * 4))
    est_p2 = (2 * c_pad * a_pad * (4 + 2 * w_isz)
              + 2 * (tn * c_pad * l_isz + tn * 4)
              + 6 * tn * max(a_pad, c_pad) * 4)
    vmem_limit = int(min(max(2 * max(est_p1, est_p2), 32 << 20), 64 << 20))

    def row_map(p, i):
        return (p * tiles_per_par + i, 0)

    # ---- pass 1: per-class counts + moments, one partial block per parallel slice
    cnt_p, sum_p, sq_p = pl.pallas_call(
        _cv_stats_kernel,
        out_shape=(jax.ShapeDtypeStruct((n_par, 1, c_pad), jnp.float32),
                   jax.ShapeDtypeStruct((n_par, c_pad, a_pad), jnp.float32),
                   jax.ShapeDtypeStruct((n_par, c_pad, a_pad), jnp.float32)),
        grid=(n_par, tiles_per_par),
        in_specs=[
            pl.BlockSpec((tn, a_pad), row_map),                     # features tile
            pl.BlockSpec((tn, 1), row_map),                         # labels tile
        ],
        out_specs=(
            pl.BlockSpec((None, 1, c_pad), lambda p, i: (p, 0, 0)),
            pl.BlockSpec((None, c_pad, a_pad), lambda p, i: (p, 0, 0)),
            pl.BlockSpec((None, c_pad, a_pad), lambda p, i: (p, 0, 0)),
        ),
        compiler_params=pltpu.CompilerParams(
            dimension_semantics=("parallel", "arbitrary"),
            vmem_limit_bytes=vmem_limit),
    )(feats_p, labels_p)

    # Tiny (C, A) finalize in the wrapper: EstimatorCV.update_CV from the zero state
    # (weight_CV is {0,1}, additional_CV == 0).
    counts = jnp.sum(cnt_p, axis=(0, 1))                            # (C_pad,)
    sums = jnp.sum(sum_p, axis=0)                                   # (C_pad, A_pad)
    sqs = jnp.sum(sq_p, axis=0)
    present = counts > 0.5
    amount = jnp.where(present, counts, 1.0)[:, None]               # Amount[Amount==0]=1
    ave = sums / amount
    var = jnp.maximum(sqs / amount - ave * ave, 0.0)                # one-pass, clamped
    cov = jnp.where(present[:, None], var, 0.0).astype(jnp.float32)

    # ---- pass 2: isda_aug + CE, per-slice scalar partial loss sums ---------------
    partial = pl.pallas_call(
        functools.partial(_aug_ce_kernel, num_classes=c),
        out_shape=jax.ShapeDtypeStruct((n_par, 1, 1), jnp.float32),
        grid=(n_par, tiles_per_par),
        in_specs=[
            pl.BlockSpec(memory_space=pltpu.MemorySpace.SMEM),      # ratio scalar
            pl.BlockSpec((tn, 1), row_map),                         # labels tile
            pl.BlockSpec((c_pad, a_pad), lambda p, i: (0, 0)),      # CoVariance (resident)
            pl.BlockSpec((c_pad, a_pad), lambda p, i: (0, 0)),      # fc weight (resident)
            pl.BlockSpec((c_pad, a_pad), lambda p, i: (0, 0)),      # W*W (resident)
            pl.BlockSpec((tn, c_pad), row_map),                     # logits tile
        ],
        out_specs=pl.BlockSpec((None, 1, 1), lambda p, i: (p, 0, 0)),
        compiler_params=pltpu.CompilerParams(
            dimension_semantics=("parallel", "arbitrary"),
            vmem_limit_bytes=vmem_limit),
    )(ratio_arr, labels_p, cov, w_p, wsq_p, logits_p)

    return jnp.sum(partial) / n                                     # CE reduction='mean'


# --------------------------------------------------------------------------- #
# Pure-JAX reference (transcription of the PyTorch module, default branch)
# --------------------------------------------------------------------------- #
def _reference(fc_weight, logits, features, labels, ratio):
    n, a = features.shape
    c = fc_weight.shape[0]
    onehot = jax.nn.one_hot(labels, c, dtype=jnp.float32)
    nxcxf = jnp.broadcast_to(features[:, None, :], (n, c, a))
    nxcxa_oh = jnp.broadcast_to(onehot[:, :, None], (n, c, a))
    fbs = nxcxf * nxcxa_oh
    amount = nxcxa_oh.sum(0)
    amount = jnp.where(amount == 0, 1.0, amount)
    ave = fbs.sum(0) / amount
    var_t = ((fbs - ave[None] * nxcxa_oh) ** 2).sum(0) / amount
    sw = onehot.sum(0)[:, None]
    w = sw / (sw + 0.0)
    w = jnp.where(jnp.isnan(w), 0.0, w)
    cov = var_t * w + w * (1 - w) * (0.0 - ave) ** 2
    w_l = fc_weight[labels]
    cv_n = cov[labels]
    sigma2 = ratio * (((fc_weight[None] - w_l[:, None]) ** 2) * cv_n[:, None]).sum(2)
    aug = logits + 0.5 * sigma2
    lse = jax.scipy.special.logsumexp(aug, axis=1)
    picked = aug[jnp.arange(n), labels]
    return jnp.mean(lse - picked)


if __name__ == "__main__":
    key = jax.random.PRNGKey(0)
    N, A, C = 8, 32, 8          # batch, feature_num, class_num (toy sizes)
    k1, k2, k3 = jax.random.split(key, 3)

    features = jax.random.normal(k1, (N, A), dtype=jnp.float32)
    fc_weight = 0.1 * jax.random.normal(k2, (C, A), dtype=jnp.float32)  # Linear(A, C).weight
    logits = features @ fc_weight.T                                     # fc(features), no bias
    target_x = jax.random.randint(k3, (N,), 0, C)
    ratio = 0.5

    ref = _reference(fc_weight, logits, features, target_x, ratio)

    # f32 producer path (bit-for-bit math layout matches the reference tolerance).
    loss = endo_loss(fc_weight, logits, features, target_x, ratio)
    jax.block_until_ready(loss)
    assert jnp.allclose(loss, ref, rtol=2e-4, atol=2e-4), (loss, ref)

    # bf16 producer path: MXU-native operands; statistics / softmax stay in f32.
    loss_bf16 = endo_loss(fc_weight.astype(jnp.bfloat16),
                          logits.astype(jnp.bfloat16),
                          features.astype(jnp.bfloat16), target_x, ratio)
    jax.block_until_ready(loss_bf16)
    assert jnp.allclose(loss_bf16, ref, rtol=5e-2, atol=5e-2), (loss_bf16, ref)

    print("KERNEL_OK")
</pallas_src>

<mosaic_0001>
module attributes {stable_mosaic.version = 11 : i64} {
  func.func @_cv_stats_kernel(%arg0: i32, %arg1: i32, %arg2: memref<8x128xf32, #tpu.memory_space<vmem>>, %arg3: memref<8x1xi32, #tpu.memory_space<vmem>>, %arg4: memref<1x1x128xf32, #tpu.memory_space<vmem>>, %arg5: memref<1x128x128xf32, #tpu.memory_space<vmem>>, %arg6: memref<1x128x128xf32, #tpu.memory_space<vmem>>) attributes {dimension_semantics = [#tpu.dimension_semantics<parallel>, #tpu.dimension_semantics<arbitrary>], iteration_bounds = array<i64: 2, 1>, scalar_prefetch = 0 : i64, scratch_operands = 0 : i64, tpu.core_type = #tpu.core_type<tc>, window_params = [{transform_indices = @transform_0, window_bounds = array<i64: 8, 128>}, {transform_indices = @transform_1, window_bounds = array<i64: 8, 1>}, {transform_indices = @transform_2, window_bounds = array<i64: 1, 1, 128>}, {transform_indices = @transform_3, window_bounds = array<i64: 1, 128, 128>}, {transform_indices = @transform_4, window_bounds = array<i64: 1, 128, 128>}]} {
    %c0_i32 = arith.constant 0 : i32
    %0 = arith.cmpi eq, %arg1, %c0_i32 : i32
    %1 = arith.extui %0 : i1 to i32
    %c0_i32_0 = arith.constant 0 : i32
    %2 = arith.cmpi ne, %1, %c0_i32_0 : i32
    scf.if %2 {
      %cst_24 = arith.constant 0.000000e+00 : f32
      %35 = vector.broadcast %cst_24 : f32 to vector<1x128xf32>
      %c0_25 = arith.constant 0 : index
      %c0_26 = arith.constant 0 : index
      %c0_27 = arith.constant 0 : index
      %36 = vector.load %arg4[%c0_25, %c0_26, %c0_27] : memref<1x1x128xf32, #tpu.memory_space<vmem>>, vector<1x1x128xf32>
      %37 = vector.shape_cast %36 : vector<1x1x128xf32> to vector<1x128xf32>
      %38 = vector.shape_cast %35 : vector<1x128xf32> to vector<1x1x128xf32>
      tpu.vector_store %arg4[%c0_25, %c0_26, %c0_27], %38 {strides = array<i32>} : memref<1x1x128xf32, #tpu.memory_space<vmem>>, vector<1x1x128xf32>,
      %cst_28 = arith.constant 0.000000e+00 : f32
      %39 = vector.broadcast %cst_28 : f32 to vector<128x128xf32>
      %c0_29 = arith.constant 0 : index
      %c0_30 = arith.constant 0 : index
      %c0_31 = arith.constant 0 : index
      %40 = vector.load %arg5[%c0_29, %c0_30, %c0_31] : memref<1x128x128xf32, #tpu.memory_space<vmem>>, vector<1x128x128xf32>
      %41 = vector.shape_cast %40 : vector<1x128x128xf32> to vector<128x128xf32>
      %42 = vector.shape_cast %39 : vector<128x128xf32> to vector<1x128x128xf32>
      tpu.vector_store %arg5[%c0_29, %c0_30, %c0_31], %42 {strides = array<i32>} : memref<1x128x128xf32, #tpu.memory_space<vmem>>, vector<1x128x128xf32>,
      %cst_32 = arith.constant 0.000000e+00 : f32
      %43 = vector.broadcast %cst_32 : f32 to vector<128x128xf32>
      %c0_33 = arith.constant 0 : index
      %c0_34 = arith.constant 0 : index
      %c0_35 = arith.constant 0 : index
      %44 = vector.load %arg6[%c0_33, %c0_34, %c0_35] : memref<1x128x128xf32, #tpu.memory_space<vmem>>, vector<1x128x128xf32>
      %45 = vector.shape_cast %44 : vector<1x128x128xf32> to vector<128x128xf32>
      %46 = vector.shape_cast %43 : vector<128x128xf32> to vector<1x128x128xf32>
      tpu.vector_store %arg6[%c0_33, %c0_34, %c0_35], %46 {strides = array<i32>} : memref<1x128x128xf32, #tpu.memory_space<vmem>>, vector<1x128x128xf32>,
    } else {
    }
    %c0 = arith.constant 0 : index
    %c0_1 = arith.constant 0 : index
    %3 = vector.load %arg2[%c0, %c0_1] : memref<8x128xf32, #tpu.memory_space<vmem>>, vector<8x128xf32>
    %c0_2 = arith.constant 0 : index
    %c0_3 = arith.constant 0 : index
    %4 = vector.load %arg3[%c0_2, %c0_3] : memref<8x1xi32, #tpu.memory_space<vmem>>, vector<8x1xi32>
    %5 = tpu.iota {dimensions = array<i32: 1>} : vector<8x128xi32>
    %6 = vector.broadcast %4 : vector<8x1xi32> to vector<8x128xi32>
    %7 = arith.cmpi eq, %5, %6 : vector<8x128xi32>
    %8 = arith.extui %7 : vector<8x128xi1> to vector<8x128xi32>
    %9 = arith.sitofp %8 : vector<8x128xi32> to vector<8x128xf32>
    %c0_4 = arith.constant 0 : index
    %c0_5 = arith.constant 0 : index
    %c0_6 = arith.constant 0 : index
    %10 = vector.load %arg4[%c0_4, %c0_5, %c0_6] : memref<1x1x128xf32, #tpu.memory_space<vmem>>, vector<1x1x128xf32>
    %11 = vector.shape_cast %10 : vector<1x1x128xf32> to vector<1x128xf32>
    %cst = arith.constant dense<0.000000e+00> : vector<128xf32>
    %12 = vector.multi_reduction <add>, %9, %cst [0] : vector<8x128xf32> to vector<128xf32>
    %13 = vector.shape_cast %12 : vector<128xf32> to vector<1x128xf32>
    %14 = arith.addf %11, %13 : vector<1x128xf32>
    %c0_7 = arith.constant 0 : index
    %c0_8 = arith.constant 0 : index
    %c0_9 = arith.constant 0 : index
    %15 = vector.load %arg4[%c0_7, %c0_8, %c0_9] : memref<1x1x128xf32, #tpu.memory_space<vmem>>, vector<1x1x128xf32>
    %16 = vector.shape_cast %15 : vector<1x1x128xf32> to vector<1x128xf32>
    %17 = vector.shape_cast %14 : vector<1x128xf32> to vector<1x1x128xf32>
    tpu.vector_store %arg4[%c0_7, %c0_8, %c0_9], %17 {strides = array<i32>} : memref<1x1x128xf32, #tpu.memory_space<vmem>>, vector<1x1x128xf32>,
    %c0_10 = arith.constant 0 : index
    %c0_11 = arith.constant 0 : index
    %c0_12 = arith.constant 0 : index
    %18 = vector.load %arg5[%c0_10, %c0_11, %c0_12] : memref<1x128x128xf32, #tpu.memory_space<vmem>>, vector<1x128x128xf32>
    %19 = vector.shape_cast %18 : vector<1x128x128xf32> to vector<128x128xf32>
    %20 = arith.extui %7 : vector<8x128xi1> to vector<8x128xi32>
    %21 = arith.sitofp %20 : vector<8x128xi32> to vector<8x128xf32>
    %cst_13 = arith.constant dense<0.000000e+00> : vector<128x128xf32>
    %22 = tpu.matmul %21, %3, %cst_13 {dimension_numbers = #tpu.dot_dimension_numbers<[0], [0], [1], [1], [0, 1, 1, 1], [], []>} : vector<8x128xf32>, vector<8x128xf32>, vector<128x128xf32> -> vector<128x128xf32>
    %23 = arith.addf %19, %22 : vector<128x128xf32>
    %c0_14 = arith.constant 0 : index
    %c0_15 = arith.constant 0 : index
    %c0_16 = arith.constant 0 : index
    %24 = vector.load %arg5[%c0_14, %c0_15, %c0_16] : memref<1x128x128xf32, #tpu.memory_space<vmem>>, vector<1x128x128xf32>
    %25 = vector.shape_cast %24 : vector<1x128x128xf32> to vector<128x128xf32>
    %26 = vector.shape_cast %23 : vector<128x128xf32> to vector<1x128x128xf32>
    tpu.vector_store %arg5[%c0_14, %c0_15, %c0_16], %26 {strides = array<i32>} : memref<1x128x128xf32, #tpu.memory_space<vmem>>, vector<1x128x128xf32>,
    %c0_17 = arith.constant 0 : index
    %c0_18 = arith.constant 0 : index
    %c0_19 = arith.constant 0 : index
    %27 = vector.load %arg6[%c0_17, %c0_18, %c0_19] : memref<1x128x128xf32, #tpu.memory_space<vmem>>, vector<1x128x128xf32>
    %28 = vector.shape_cast %27 : vector<1x128x128xf32> to vector<128x128xf32>
    %29 = arith.mulf %3, %3 : vector<8x128xf32>
    %cst_20 = arith.constant dense<0.000000e+00> : vector<128x128xf32>
    %30 = tpu.matmul %9, %29, %cst_20 {dimension_numbers = #tpu.dot_dimension_numbers<[0], [0], [1], [1], [0, 1, 1, 1], [], []>} : vector<8x128xf32>, vector<8x128xf32>, vector<128x128xf32> -> vector<128x128xf32>
    %31 = arith.addf %28, %30 : vector<128x128xf32>
    %c0_21 = arith.constant 0 : index
    %c0_22 = arith.constant 0 : index
    %c0_23 = arith.constant 0 : index
    %32 = vector.load %arg6[%c0_21, %c0_22, %c0_23] : memref<1x128x128xf32, #tpu.memory_space<vmem>>, vector<1x128x128xf32>
    %33 = vector.shape_cast %32 : vector<1x128x128xf32> to vector<128x128xf32>
    %34 = vector.shape_cast %31 : vector<128x128xf32> to vector<1x128x128xf32>
    tpu.vector_store %arg6[%c0_21, %c0_22, %c0_23], %34 {strides = array<i32>} : memref<1x128x128xf32, #tpu.memory_space<vmem>>, vector<1x128x128xf32>,
    return
  }
  func.func @transform_0(%arg0: i32, %arg1: i32) -> (i32, i32) {
    %c1_i32 = arith.constant 1 : i32
    %0 = arith.muli %arg0, %c1_i32 : i32
    %1 = arith.addi %0, %arg1 : i32
    %c0_i32 = arith.constant 0 : i32
    %c0_i32_0 = arith.constant 0 : i32
    return %1, %c0_i32 : i32, i32
  }
  func.func @transform_1(%arg0: i32, %arg1: i32) -> (i32, i32) {
    %c1_i32 = arith.constant 1 : i32
    %0 = arith.muli %arg0, %c1_i32 : i32
    %1 = arith.addi %0, %arg1 : i32
    %c0_i32 = arith.constant 0 : i32
    %c0_i32_0 = arith.constant 0 : i32
    return %1, %c0_i32 : i32, i32
  }
  func.func @transform_2(%arg0: i32, %arg1: i32) -> (i32, i32, i32) {
    %c0_i32 = arith.constant 0 : i32
    %c0_i32_0 = arith.constant 0 : i32
    %c0_i32_1 = arith.constant 0 : i32
    return %arg0, %c0_i32, %c0_i32_0 : i32, i32, i32
  }
  func.func @transform_3(%arg0: i32, %arg1: i32) -> (i32, i32, i32) {
    %c0_i32 = arith.constant 0 : i32
    %c0_i32_0 = arith.constant 0 : i32
    %c0_i32_1 = arith.constant 0 : i32
    return %arg0, %c0_i32, %c0_i32_0 : i32, i32, i32
  }
  func.func @transform_4(%arg0: i32, %arg1: i32) -> (i32, i32, i32) {
    %c0_i32 = arith.constant 0 : i32
    %c0_i32_0 = arith.constant 0 : i32
    %c0_i32_1 = arith.constant 0 : i32
    return %arg0, %c0_i32, %c0_i32_0 : i32, i32, i32
  }
}

</mosaic_0001>

<bundles_post_ra>
// kernel: tpu_custom_call.1
= control target key start
LH: loop header
LB: loop body
LE: loop exit
PB: predicated region body
PF: predicated region fallthrough
CT: control target
= control target key end

     0   :  { %10 = vsyncpa [#allocation3], 0  ;;  %s1602_s0 = inlined_call_operand.vmem [shape: f32[16,128], index: 0, kind: input, shape index: {}]   ;;  %s1603_s1 = inlined_call_operand.vmem [shape: s32[16,1], index: 1, kind: input, shape index: {}]   ;;  %s1604_s2 = inlined_call_operand.hbm [shape: f32[2,1,128], index: 2, kind: output, shape index: {0}]   ;;  %s1605_s3 = inlined_call_operand.hbm [shape: f32[2,128,128], index: 3, kind: output, shape index: {1}]   ;;  %s1606_s4 = inlined_call_operand.hbm [shape: f32[2,128,128], index: 4, kind: output, shape index: {2}]  }
   0x1   :  { %12 = vsyncpa [#allocation3 + $0x1], 0 }
   0x2   :  { %13 = vsyncpa [#allocation5], 0 }
   0x3   :  { %15 = vsyncpa [#allocation5 + $0x1], 0  ;;  %s1343_s15 = smov 0   ;;  %s1345_s16 = smov 0  }
   0x4   :  { %s1347_s17 = smov 0   ;;  %s1349_s18 = smov 0  }
   0x5   :  { %s1351_s19 = smov 0   ;;  %s1353_s20 = smov 0  }
   0x6 LB: > { %s968_s21 = sadd.s32 4294967295, %s1309_s20   ;;  %s969_s22 = sadd.s32 4294967294, %s1309_s20   ;;  %s1309_s20 = sphi %s1353_s20, %s21_s20   ;;  %s1305_s19 = sphi %s1351_s19, %s1613_s19   ;;  %s1301_s18 = sphi %s1349_s18, %s1612_s18   ;;  %s1297_s17 = sphi %s1347_s17, %s1611_s17   ;;  %s1293_s16 = sphi %s1345_s16, %s1610_s16   ;;  %s1289_s15 = sphi %s1343_s15, %s1609_s15  }
   0x7   : > { %s33_s23 = sadd.s32 1, %s1305_s19  ;;  %s96_s24 = sadd.s32 1, %s1297_s17 }
   0x8   : > { %p35_p0 = scmp.ge.s32.totalorder %s33_s23, 2  ;;  %p106_p1 = scmp.ne.s32.totalorder %s1297_s17, %s1293_s16 }
   0x9   : > { %p107_p2 = scmp.eq.s32.totalorder %s968_s21, 1  ;;  %p112_p3 = scmp.ne.s32.totalorder %s1293_s16, %s1289_s15 }
   0xa   : > { %s1615_s23 = smov (%p35_p0, %s33_s23), 0  ;;  %p113_p5 = scmp.eq.s32.totalorder %s969_s22, 1 }
   0xb   : > { %p1385_p4 = por %p107_p2, %p106_p1  ;;  %s93_s26 = ssub.s32 %s1305_s19, %s1615_s23 }
   0xc   : > { %p972_p6 = scmp.ge.s32.totalorder %s1309_s20, 1  ;;  %p94_p7 = scmp.eq.s32.totalorder %s93_s26, 0 }
   0xd   : > { %p1394_p8 = por %p113_p5, %p112_p3  ;;  %p201_p9 = scmp.lt.s32.totalorder %s1309_s20, 3 }
   0xe   : > { %s1400_s28 = scalar_select %p94_p7, %s1297_s17, %s96_s24  }
   0xf   : > { %p202_p10 = pnand %p972_p6, %p201_p9 }
  0x10   : > { %p242_p11 = scmp.lt.s32.totalorder (!%p202_p10), %s1301_s18, 1  ;;  %s1408_s8 = sand.u32 (!%p202_p10), 1, %s1293_s16  }
  0x11   : > { %205 = sbr.rel (%p202_p10) target bundleno = 568 (0x238), region = 28  ;;  %s1411_s9 = scalar_lea.vmem (!%p202_p10), [#allocation2], %s1408_s8 }
  0x12   : > { %s1012_s13 = sshll.u32 (!%p202_p10), %s1301_s18, 4  ;;  %s800_s14 = sshll.u32 (!%p202_p10), %s1411_s9, 4  ;;  %s801_s14 = int_to_ptr.vmem [resolvable:$true] %s800_s14 }
  0x13   : > { %s1177_s5 = scalar_lea.vmem (!%p202_p10), %s801_s14, 16  ;;  %s1313_s6 = smov (!%p202_p10), [#allocation2]  }
  0x14   : > { %p1178_p12 = scmp.ne.s32.totalorder (!%p202_p10), %s801_s14, %s1177_s5 }
  0x16   : > { %v1311_v0 = vmov 0   ;;  %s243_s29 = scalar_select %p242_p11, %s1301_s18, 1  ;;  %v1312_v2 = vmov 0.0   ;;  %v292_v3 = vlaneseq  ;;  %vm357_vm1 = vcmask 64512  }
  0x17   : > { %1176 = vset.pattern.permute.xlu0 %v1311_v0  ;;  %257 = vst [vmem:[%s1411_s9] sm:$0x1] %v1312_v2  ;;  %p1179_p13 = pnand %p1178_p12, %p1385_p4 }
  0x18   : > { %s975_s30 = sshll.u32 %s243_s29, 3  ;;  %v293_v4 = vand.u32 127, %v292_v3  ;;  %s798_s29 = scalar_lea.hbm %s1604_s2, %s1012_s13 }
  0x19   : > { %s251_s7 = scalar_lea.vmem %s1603_s1, %s975_s30  ;;  %s245_s12 = scalar_lea.vmem %s1602_s0, %s975_s30 }
  0x1a   : > { %v291_v1 = vld [vmem:[%s251_s7] sm:$0xff]  ;;  %s778_s30 = scalar_lea.sflag [#allocation3], %s1408_s8  ;;  %p1180_p0 = pneg %p1179_p13 }
  0x1b   : > { %295 = vperm.xlu0 %1176, %v291_v1   ;;  %v290_v5 = vld [vmem:[%s245_s12] sm:$0xff]  ;;  %s1181_s7 = sshll.u32 %s1313_s6, 4  ;;  %s1182_s7 = int_to_ptr.vmem [resolvable:$false] %s1181_s7 }
  0x1c   : > { %1055 = vmatprep.subr.mxu0 %v290_v5  ;;  %v599_v7 = vmul.f32 %v290_v5, %v290_v5  ;;  %s1183_s10 = scalar_lea.vmem %s1182_s7, 32  ;;  %p1184_p1 = scmp.lt.s32.totalorder %s801_s14, %s1182_s7 }
  0x1d   : > { %1056 = vmatpush3.msra.mxu0 %v290_v5  ;;  %p1185_p2 = scmp.lt.s32.totalorder %s1183_s10, %s1177_s5 }
  0x1e   : > { %1081 = vmatprep.subr.mxu1 %v599_v7  ;;  %v300_v14 = vld [vmem:[%s1411_s9] sm:$0x1] }
  0x1f   : > { %1082 = vmatpush3.msra.mxu1 %v599_v7  ;;  %p1186_p3 = por %p1185_p2, %p1184_p1 }
  0x21   : > { %p1187_p5 = pnand %p1186_p3, %p1180_p0 }
  0x96   : > { %v296_v6 = vpop.permute.xlu0 %295 }
  0x97   : > { %vm297_vm0 = vcmp.eq.s32.totalorder %v293_v4, %v296_v6 }
  0x98   : > { %v977_v8 = vsel %vm297_vm0, 1.0, %v1312_v2 }
  0x99   : > { %v301_v9 = vrot.slane %v977_v8, 4  ;;  %325 = vxpose.xlu0.b32.start.end [1/1] (short) %v977_v8, 128 }
  0x9b   : > { %v302_v10 = vadd.f32 %v977_v8, %v301_v9 }
  0x9d   : > { %v303_v11 = vrot.slane %v302_v10, 2 }
  0x9f   : > { %v304_v12 = vadd.f32 %v303_v11, %v302_v10 }
  0xa1   : > { %v305_v13 = vrot.slane %v304_v12, 1 }
  0xa3   : > { %v306_v15 = vadd.f32 %v305_v13, %v304_v12 }
  0xa5   : > { %v307_v16 = vadd.f32 %v306_v15, %v300_v14 }
  0xa7   : > { %308 = vst [vmem:[%s1411_s9] sm:$0x1] %v307_v16 }
 0x115   : > { %v341_v17 = vpop.trf.xlu0 }
 0x116   : > { %1057 = vmatprep.mubr.msk.f32.mxu0 %vm357_vm1, %v341_v17  ;;  %1083 = vmatprep.mubr.msk.f32.mxu1 %vm357_vm1, %v341_v17 }
 0x119   : > { %v342_v18 = vpop.trf.xlu0 }
 0x11a   : > { %1058 = vmatmul.mubr.msk.f32.vlgmr.msra.gmra.mxu0 %vm357_vm1, %v342_v18  ;;  %1084 = vmatmul.mubr.msk.f32.vlgmr.msra.gmra.mxu1 %vm357_vm1, %v342_v18 }
 0x11d   : > { %v343_v19 = vpop.trf.xlu0 }
 0x11e   : > { %1060 = vmatprep.mubr.msk.f32.mxu0 %vm357_vm1, %v343_v19  ;;  %1086 = vmatprep.mubr.msk.f32.mxu1 %vm357_vm1, %v343_v19 }
 0x121   : > { %v344_v20 = vpop.trf.xlu0 }
 0x122   : > { %1061 = vmatmul.mubr.msk.f32.gmra.mxu0 %vm357_vm1, %v344_v20  ;;  %1087 = vmatmul.mubr.msk.f32.gmra.mxu1 %vm357_vm1, %v344_v20 }
 0x125   : > { %v345_v21 = vpop.trf.xlu0 }
 0x126   : > { %1063 = vmatprep.mubr.msk.f32.mxu0 %vm357_vm1, %v345_v21  ;;  %1089 = vmatprep.mubr.msk.f32.mxu1 %vm357_vm1, %v345_v21 }
 0x129   : > { %v346_v22 = vpop.trf.xlu0 }
 0x12a   : > { %1064 = vmatmul.mubr.msk.f32.gmra.mxu0 %vm357_vm1, %v346_v22  ;;  %1090 = vmatmul.mubr.msk.f32.gmra.mxu1 %vm357_vm1, %v346_v22 }
 0x12d   : > { %v347_v23 = vpop.trf.xlu0 }
 0x12e   : > { %1066 = vmatprep.mubr.msk.f32.mxu0 %vm357_vm1, %v347_v23  ;;  %1092 = vmatprep.mubr.msk.f32.mxu1 %vm357_vm1, %v347_v23 }
 0x131   : > { %v348_v24 = vpop.trf.xlu0 }
 0x132   : > { %1067 = vmatmul.mubr.msk.f32.gmra.mxu0 %vm357_vm1, %v348_v24  ;;  %1093 = vmatmul.mubr.msk.f32.gmra.mxu1 %vm357_vm1, %v348_v24 }
 0x135   : > { %v349_v25 = vpop.trf.xlu0 }
 0x136   : > { %1069 = vmatprep.mubr.msk.f32.mxu0 %vm357_vm1, %v349_v25  ;;  %1095 = vmatprep.mubr.msk.f32.mxu1 %vm357_vm1, %v349_v25 }
 0x139   : > { %v350_v26 = vpop.trf.xlu0 }
 0x13a   : > { %1070 = vmatmul.mubr.msk.f32.gmra.mxu0 %vm357_vm1, %v350_v26  ;;  %1096 = vmatmul.mubr.msk.f32.gmra.mxu1 %vm357_vm1, %v350_v26 }
 0x13d   : > { %v351_v27 = vpop.trf.xlu0 }
 0x13e   : > { %1072 = vmatprep.mubr.msk.f32.mxu0 %vm357_vm1, %v351_v27  ;;  %1098 = vmatprep.mubr.msk.f32.mxu1 %vm357_vm1, %v351_v27 }
 0x141   : > { %v352_v28 = vpop.trf.xlu0 }
 0x142   : > { %1073 = vmatmul.mubr.msk.f32.gmra.mxu0 %vm357_vm1, %v352_v28  ;;  %1099 = vmatmul.mubr.msk.f32.gmra.mxu1 %vm357_vm1, %v352_v28 }
 0x145   : > { %v353_v29 = vpop.trf.xlu0 }
 0x146   : > { %1075 = vmatprep.mubr.msk.f32.mxu0 %vm357_vm1, %v353_v29  ;;  %1101 = vmatprep.mubr.msk.f32.mxu1 %vm357_vm1, %v353_v29 }
 0x149   : > { %v354_v30 = vpop.trf.xlu0 }
 0x14a   : > { %1076 = vmatmul.mubr.msk.f32.gmra.mxu0 %vm357_vm1, %v354_v30  ;;  %1102 = vmatmul.mubr.msk.f32.gmra.mxu1 %vm357_vm1, %v354_v30 }
 0x14d   : > { %v355_v31 = vpop.trf.xlu0 }
 0x14e   : > { %1078 = vmatprep.mubr.msk.f32.mxu0 %vm357_vm1, %v355_v31  ;;  %1104 = vmatprep.mubr.msk.f32.mxu1 %vm357_vm1, %v355_v31 }
 0x151   : > { %v356_v32 = vpop.trf.xlu0 }
 0x152   : > { %1079 = vmatmul.mubr.msk.f32.gmra.mxu0 %vm357_vm1, %v356_v32  ;;  %1105 = vmatmul.mubr.msk.f32.gmra.mxu1 %vm357_vm1, %v356_v32 }
 0x153   : > { %1190 = shalt.err (!%p1187_p5)
}
 0x154   : > { %s1191_s9 = scalar_lea.hbm %s798_s29, 16  ;;  %s1195_s13 = scalar_lea.hbm %s1604_s2, 32 }
 0x155   : > { %p1192_p6 = scmp.ne.s32.totalorder %s798_s29, %s1191_s9  ;;  %p1196_p10 = scmp.lt.s32.totalorder %s798_s29, %s1604_s2 }
 0x156   : > { %p1197_p11 = scmp.lt.s32.totalorder %s1195_s13, %s1191_s9 }
 0x157   : > { %p1193_p7 = pnand %p1192_p6, %p1385_p4 }
 0x158   : > { %p1198_p12 = por %p1197_p11, %p1196_p10 }
 0x159   : > { %p1194_p9 = pneg %p1193_p7 }
 0x15b   : > { %p1199_p13 = pnand %p1198_p12, %p1194_p9 }
 0x15d   : > { %1202 = shalt.err (!%p1199_p13)
}
 0x15e   : > { %1107 = dma.vmem_to_hbm [thread:$0]  (%p1385_p4), %s801_s14, 16, %s798_s29, %s778_s30  }
 0x15f   : > { %s973_s5 = sshll.u32 %s1408_s8, 7  ;;  %s1504_s8 = sand.u32 1, %s968_s21  }
 0x160   : > { %s1470_s6 = scalar_lea.vmem [#allocation4], %s973_s5  ;;  %s1473_s7 = scalar_lea.vmem [#allocation6], %s973_s5 }
 0x161   : > { %s1019_s14 = sshll.u32 %s1301_s18, 11  ;;  %s813_s29 = sshll.u32 %s1470_s6, 4  ;;  %s1516_s29 = int_to_ptr.vmem [resolvable:$true] %s813_s29 }
 0x162   : > { %s829_s30 = sshll.u32 %s1473_s7, 4  ;;  %s1512_s11 = scalar_lea.hbm %s1605_s3, %s1019_s14  ;;  %s1523_s30 = int_to_ptr.vmem [resolvable:$true] %s829_s30 }
 0x163   : > { %s1521_s18 = scalar_lea.hbm %s1606_s4, %s1019_s14  ;;  %s782_s13 = scalar_lea.sflag [#allocation5], %s1504_s8 }
 0x164   : > { %s1203_s24 = scalar_lea.vmem %s1516_s29, 2048  ;;  %s1314_s26 = smov [#allocation4]  }
 0x165   : > { %p1204_p0 = scmp.ne.s32.totalorder %s1516_s29, %s1203_s24  ;;  %s1207_s5 = sshll.u32 %s1314_s26, 4  ;;  %s1208_s5 = int_to_ptr.vmem [resolvable:$false] %s1207_s5 }
 0x166   : > { %s1209_s10 = scalar_lea.vmem %s1208_s5, 4096  ;;  %p1210_p3 = scmp.lt.s32.totalorder %s1516_s29, %s1208_s5 }
 0x167   : > { %p1205_p1 = pnand %p1204_p0, %p1385_p4  ;;  %p1211_p5 = scmp.lt.s32.totalorder %s1209_s10, %s1203_s24 }
 0x169   : > { %p1206_p2 = pneg %p1205_p1  ;;  %p1212_p6 = por %p1211_p5, %p1210_p3 }
 0x16b   : > { %p1213_p7 = pnand %p1212_p6, %p1206_p2 }
 0x1da   : > { %v1059_v33 = vpop.f32.mrf.mxu0  ;;  %v1085_v34 = vpop.f32.mrf.mxu1 }
 0x1db   : > { %568 = vst [vmem:[%s1470_s6 + $0x8] sm:$0xff] %v1059_v33  ;;  %762 = vst [vmem:[%s1473_s7 + $0x8] sm:$0xff] %v1085_v34 }
 0x1dc   : > { %v472_v35 = vpop.f32.mrf.mxu0  ;;  %v666_v36 = vpop.f32.mrf.mxu1 }
 0x1dd   : > { %567 = vst [vmem:[%s1470_s6] sm:$0xff] %v472_v35  ;;  %761 = vst [vmem:[%s1473_s7] sm:$0xff] %v666_v36 }
 0x1e2   : > { %v1062_v37 = vpop.f32.mrf.mxu0  ;;  %v1088_v38 = vpop.f32.mrf.mxu1 }
 0x1e3   : > { %570 = vst [vmem:[%s1470_s6 + $0x18] sm:$0xff] %v1062_v37  ;;  %764 = vst [vmem:[%s1473_s7 + $0x18] sm:$0xff] %v1088_v38 }
 0x1e4   : > { %v482_v39 = vpop.f32.mrf.mxu0  ;;  %v676_v40 = vpop.f32.mrf.mxu1 }
 0x1e5   : > { %569 = vst [vmem:[%s1470_s6 + $0x10] sm:$0xff] %v482_v39  ;;  %763 = vst [vmem:[%s1473_s7 + $0x10] sm:$0xff] %v676_v40 }
 0x1ea   : > { %v1065_v41 = vpop.f32.mrf.mxu0  ;;  %v1091_v42 = vpop.f32.mrf.mxu1 }
 0x1eb   : > { %572 = vst [vmem:[%s1470_s6 + $0x28] sm:$0xff] %v1065_v41  ;;  %766 = vst [vmem:[%s1473_s7 + $0x28] sm:$0xff] %v1091_v42 }
 0x1ec   : > { %v492_v43 = vpop.f32.mrf.mxu0  ;;  %v686_v44 = vpop.f32.mrf.mxu1 }
 0x1ed   : > { %571 = vst [vmem:[%s1470_s6 + $0x20] sm:$0xff] %v492_v43  ;;  %765 = vst [vmem:[%s1473_s7 + $0x20] sm:$0xff] %v686_v44 }
 0x1f2   : > { %v1068_v45 = vpop.f32.mrf.mxu0  ;;  %v1094_v46 = vpop.f32.mrf.mxu1 }
 0x1f3   : > { %574 = vst [vmem:[%s1470_s6 + $0x38] sm:$0xff] %v1068_v45  ;;  %768 = vst [vmem:[%s1473_s7 + $0x38] sm:$0xff] %v1094_v46 }
 0x1f4   : > { %v502_v47 = vpop.f32.mrf.mxu0  ;;  %v696_v48 = vpop.f32.mrf.mxu1 }
 0x1f5   : > { %573 = vst [vmem:[%s1470_s6 + $0x30] sm:$0xff] %v502_v47  ;;  %767 = vst [vmem:[%s1473_s7 + $0x30] sm:$0xff] %v696_v48 }
 0x1fa   : > { %v1071_v49 = vpop.f32.mrf.mxu0  ;;  %v1097_v50 = vpop.f32.mrf.mxu1 }
 0x1fb   : > { %576 = vst [vmem:[%s1470_s6 + $0x48] sm:$0xff] %v1071_v49  ;;  %770 = vst [vmem:[%s1473_s7 + $0x48] sm:$0xff] %v1097_v50 }
 0x1fc   : > { %v512_v51 = vpop.f32.mrf.mxu0  ;;  %v706_v52 = vpop.f32.mrf.mxu1 }
 0x1fd   : > { %575 = vst [vmem:[%s1470_s6 + $0x40] sm:$0xff] %v512_v51  ;;  %769 = vst [vmem:[%s1473_s7 + $0x40] sm:$0xff] %v706_v52 }
 0x202   : > { %v1074_v53 = vpop.f32.mrf.mxu0  ;;  %v1100_v54 = vpop.f32.mrf.mxu1 }
 0x203   : > { %578 = vst [vmem:[%s1470_s6 + $0x58] sm:$0xff] %v1074_v53  ;;  %772 = vst [vmem:[%s1473_s7 + $0x58] sm:$0xff] %v1100_v54 }
 0x204   : > { %v522_v55 = vpop.f32.mrf.mxu0  ;;  %v716_v56 = vpop.f32.mrf.mxu1 }
 0x205   : > { %577 = vst [vmem:[%s1470_s6 + $0x50] sm:$0xff] %v522_v55  ;;  %771 = vst [vmem:[%s1473_s7 + $0x50] sm:$0xff] %v716_v56 }
 0x20a   : > { %v1077_v57 = vpop.f32.mrf.mxu0  ;;  %v1103_v58 = vpop.f32.mrf.mxu1 }
 0x20b   : > { %580 = vst [vmem:[%s1470_s6 + $0x68] sm:$0xff] %v1077_v57  ;;  %774 = vst [vmem:[%s1473_s7 + $0x68] sm:$0xff] %v1103_v58 }
 0x20c   : > { %v532_v59 = vpop.f32.mrf.mxu0  ;;  %v726_v60 = vpop.f32.mrf.mxu1 }
 0x20d   : > { %579 = vst [vmem:[%s1470_s6 + $0x60] sm:$0xff] %v532_v59  ;;  %773 = vst [vmem:[%s1473_s7 + $0x60] sm:$0xff] %v726_v60 }
 0x212   : > { %v1080_v61 = vpop.f32.mrf.mxu0  ;;  %v1106_v62 = vpop.f32.mrf.mxu1 }
 0x213   : > { %582 = vst [vmem:[%s1470_s6 + $0x78] sm:$0xff] %v1080_v61  ;;  %776 = vst [vmem:[%s1473_s7 + $0x78] sm:$0xff] %v1106_v62 }
 0x214   : > { %v542_v63 = vpop.f32.mrf.mxu0  ;;  %v736_v0 = vpop.f32.mrf.mxu1 }
 0x215   : > { %581 = vst [vmem:[%s1470_s6 + $0x70] sm:$0xff] %v542_v63  ;;  %775 = vst [vmem:[%s1473_s7 + $0x70] sm:$0xff] %v736_v0 }
 0x216   : > { %1216 = shalt.err (!%p1213_p7)
}
 0x217   : > { %s1217_s6 = scalar_lea.hbm %s1512_s11, 2048  ;;  %s1221_s9 = scalar_lea.hbm %s1605_s3, 4096 }
 0x218   : > { %p1218_p9 = scmp.ne.s32.totalorder %s1512_s11, %s1217_s6  ;;  %p1222_p12 = scmp.lt.s32.totalorder %s1512_s11, %s1605_s3 }
 0x219   : > { %p1223_p13 = scmp.lt.s32.totalorder %s1221_s9, %s1217_s6 }
 0x21a   : > { %p1219_p10 = pnand %p1218_p9, %p1385_p4 }
 0x21b   : > { %p1224_p0 = por %p1223_p13, %p1222_p12 }
 0x21c   : > { %p1220_p11 = pneg %p1219_p10 }
 0x21e   : > { %p1225_p1 = pnand %p1224_p0, %p1220_p11 }
 0x220   : > { %1228 = shalt.err (!%p1225_p1)
}
 0x221   : > { %s1315_s24 = smov 128   ;;  %s1316_s26 = smov 8  }
 0x222   : > { %1108 = dma.vmem_to_hbm [thread:$0]  (%p1385_p4), %s1516_s29, 2048, %s1512_s11, %s782_s13, %s1315_s24, %s1315_s24, %s1316_s26  }
 0x223   : > { %s1229_s5 = scalar_lea.vmem %s1523_s30, 2048  ;;  %s1317_s10 = smov [#allocation6]  }
 0x224   : > { %p1230_p2 = scmp.ne.s32.totalorder %s1523_s30, %s1229_s5  ;;  %s1233_s6 = sshll.u32 %s1317_s10, 4  ;;  %s1234_s6 = int_to_ptr.vmem [resolvable:$false] %s1233_s6 }
 0x225   : > { %s1235_s7 = scalar_lea.vmem %s1234_s6, 4096  ;;  %p1236_p6 = scmp.lt.s32.totalorder %s1523_s30, %s1234_s6 }
 0x226   : > { %p1231_p3 = pnand %p1230_p2, %p1385_p4  ;;  %p1237_p7 = scmp.lt.s32.totalorder %s1235_s7, %s1229_s5 }
 0x228   : > { %p1232_p5 = pneg %p1231_p3  ;;  %p1238_p9 = por %p1237_p7, %p1236_p6 }
 0x22a   : > { %p1239_p10 = pnand %p1238_p9, %p1232_p5 }
 0x22c   : > { %1242 = shalt.err (!%p1239_p10)
}
 0x22d   : > { %s1243_s14 = scalar_lea.hbm %s1521_s18, 2048  ;;  %s1247_s9 = scalar_lea.hbm %s1606_s4, 4096 }
 0x22e   : > { %p1244_p11 = scmp.ne.s32.totalorder %s1521_s18, %s1243_s14  ;;  %p1248_p0 = scmp.lt.s32.totalorder %s1521_s18, %s1606_s4 }
 0x22f   : > { %p1249_p1 = scmp.lt.s32.totalorder %s1247_s9, %s1243_s14 }
 0x230   : > { %p1245_p12 = pnand %p1244_p11, %p1385_p4 }
 0x231   : > { %p1250_p2 = por %p1249_p1, %p1248_p0 }
 0x232   : > { %p1246_p13 = pneg %p1245_p12 }
 0x234   : > { %p1251_p3 = pnand %p1250_p2, %p1246_p13 }
 0x236   : > { %1254 = shalt.err (!%p1251_p3)
}
 0x237   : > { %1109 = dma.vmem_to_hbm [thread:$0]  (%p1385_p4), %s1523_s30, 2048, %s1521_s18, %s782_s13, %s1315_s24, %s1315_s24, %s1316_s26  }
 0x238 PF: > { %p1123_p5 = scmp.ge.s32.totalorder %s1309_s20, 2  ;;  %s844_s5 = sand.u32 1, %s1289_s15  }
 0x239   : > { %s845_s10 = scalar_lea.sflag [#allocation3], %s844_s5 }
 0x23a   : > { %p1114_p6 = pnand %p1123_p5, %p1394_p8 }
 0x23c   : > { %p1115_p7 = pneg %p1114_p6 }
 0x23e   : > { %1280 = dma.done.wait (%p1115_p7), %s845_s10, 16  }
 0x23f   : > { %1282 = vsyncadd (%p1115_p7), %s845_s10, 4294967280  ;;  %s852_s25 = sand.u32 1, %s969_s22  }
 0x240   : > { %s853_s6 = scalar_lea.sflag [#allocation5], %s852_s25 }
 0x241   : > { %1284 = dma.done.wait (%p1115_p7), %s853_s6, 4096  }
 0x242   : > { %1286 = vsyncadd (%p1115_p7), %s853_s6, 4294963200  ;;  %s21_s20 = sadd.s32 1, %s1309_s20   ;;  %s1609_s15 = smov %s1293_s16 }
 0x243   : > { %p18_p4 = scmp.ge.s32.totalorder %s21_s20, 4   ;;  %s1610_s16 = smov %s1297_s17 }
 0x244   : > { %s1611_s17 = smov %s1400_s28  ;;  %s1612_s18 = smov %s1305_s19 }
 0x245   : > { %s1613_s19 = smov %s1615_s23  ;;  %20 = sbr.rel (!%p18_p4) target bundleno = 6 (0x6), region = 102 }
 0x24a   :  { %867 = vsyncpa [#allocation3], 1 }
 0x24b   :  { %869 = vsyncpa [#allocation3 + $0x1], 1 }
 0x24c   :  { %870 = vsyncpa [#allocation5], 1 }
 0x24d   :  { %872 = vsyncpa [#allocation5 + $0x1], 1 }

</bundles_post_ra>
